<compile_context>
chip_gen: v6e
topology: v6e:2x2x1
jax: 0.10.0
libtpu: 0.0.40
codegen_flags: <defaults>
</compile_context>

<pallas_src>
import functools
import math

import jax
import jax.numpy as jnp
from jax import lax
from jax.experimental import pallas as pl
from jax.experimental.pallas import tpu as pltpu


# --------------------------- fused forward kernel ----------------------------
def _fused_attention_kernel(x3_ref, xres_ref, gamma_ref, beta_ref, mask_ref,
                            sel_ref, w_ref, b_ref, o_ref, *,
                            group_elems, eps, m):
    C = x3_ref.shape[1]
    xb = x3_ref[0]                                        # (C, S) channel-major

    # ---------------- GroupNorm (biased variance, like PyTorch) --------------
    ch_sum = jnp.sum(xb, axis=1, keepdims=True)           # (C, 1)
    ch_sq = jnp.sum(xb * xb, axis=1, keepdims=True)       # (C, 1)
    mask = mask_ref[...]                                  # (C, C) same-group 0/1
    gsum = jnp.dot(mask, ch_sum, preferred_element_type=jnp.float32)
    gsq = jnp.dot(mask, ch_sq, preferred_element_type=jnp.float32)
    mean = gsum / group_elems
    var = jnp.maximum(gsq / group_elems - mean * mean, 0.0)
    inv = lax.rsqrt(var + eps)
    xn = (xb - mean) * inv * gamma_ref[...] + beta_ref[...]   # (C, S)

    # Pre-transposed weights (C_in, C_out); d_k already folded into wq_t / bq.
    wq_t = w_ref[0]; wk_t = w_ref[1]; wv_t = w_ref[2]; wo_t = w_ref[3]
    bq = b_ref[0]; bk = b_ref[1]; bv = b_ref[2]; bo = b_ref[3]     # each (1, C)

    t_lhs = (((0,), (0,)), ((), ()))   # contract lhs dim0 / rhs dim0 -> lhs.T @ rhs
    t_rhs = (((1,), (1,)), ((), ()))   # contract lhs dim1 / rhs dim1 -> lhs @ rhs.T

    # The PyTorch forward reinterprets the row-major (B*S, C) Linear outputs as
    # (B, C, S) via .view().  With S = m*C that reinterpret is equivalent to
    # splitting the Linear-output rows into m interleaved groups {i*m + a}:
    #   scores = d_k * sum_a Qa @ Ka^T,  Qa[i, :] = q_linear(xn2 row i*m + a).
    # sel[a] is the (S, C) 0/1 matrix selecting columns i*m + a of xn.
    ys = []
    scores = jnp.zeros((C, C), jnp.float32)
    for a in range(m):
        ya = jnp.dot(xn, sel_ref[a], preferred_element_type=jnp.float32)  # (C, C) = Xa^T
        ys.append(ya)
        qa = lax.dot_general(ya, wq_t, t_lhs, preferred_element_type=jnp.float32) + bq
        ka = lax.dot_general(ya, wk_t, t_lhs, preferred_element_type=jnp.float32) + bk
        scores = scores + lax.dot_general(qa, ka, t_rhs,
                                          preferred_element_type=jnp.float32)

    # softmax(dim=-1), max-stabilized; reciprocal on the EUP slot.
    scores = scores - jnp.max(scores, axis=-1, keepdims=True)
    e = jnp.exp(scores)
    weights = e * pl.reciprocal(jnp.sum(e, axis=-1, keepdims=True), approx=True)

    # attention -> permute -> output Linear -> .view -> residual, per block a.
    # Rows [a*C, (a+1)*C) of the (S, C) result equal (weights @ Va)^T @ Wo^T + bo.
    for a in range(m):
        va = lax.dot_general(ys[a], wv_t, t_lhs, preferred_element_type=jnp.float32) + bv
        za = jnp.dot(weights, va, preferred_element_type=jnp.float32)      # (C, C)
        out_a = lax.dot_general(za, wo_t, t_lhs,
                                preferred_element_type=jnp.float32) + bo
        o_ref[0, a * C:(a + 1) * C, :] = out_a + xres_ref[0, a * C:(a + 1) * C, :]


# --------------------------------- wrapper -----------------------------------
def attention_forward(x, params, num_groups, eps=1e-5):
    B, C, H, W = x.shape
    S = H * W
    assert C % num_groups == 0, "GroupNorm requires C % num_groups == 0"
    # TODO(synk): the single-kernel block decomposition of the PyTorch .view()
    # reinterpret assumes S % C == 0; other shapes would need a different split.
    assert S % C == 0, "fused kernel assumes H*W is a multiple of in_channels"
    m = S // C
    d_k = 1.0 / math.sqrt(C)

    x3 = x.reshape(B, C, S)     # x.view(B, C, S)        (free, flat reshape)
    xres = x.reshape(B, S, C)   # same bytes seen in the (S, C) frame in which
                                # the output Linear produces rows (free reshape)

    ids = jnp.arange(C) // (C // num_groups)
    mask = (ids[:, None] == ids[None, :]).astype(jnp.float32)          # (C, C)

    # sel[a, s, i] == 1  iff  s == i*m + a
    s_idx = jnp.arange(S)[None, :, None]
    tgt = jnp.arange(C)[None, None, :] * m + jnp.arange(m)[:, None, None]
    sel = (s_idx == tgt).astype(jnp.float32)                           # (m, S, C)

    # Pre-transposed (C_in, C_out) weights, stacked; d_k folded into Q.
    w_all = jnp.stack([params["wq"].T * d_k, params["wk"].T,
                       params["wv"].T, params["wo"].T], axis=0)        # (4, C, C)
    b_all = jnp.stack([params["bq"] * d_k, params["bk"],
                       params["bv"], params["bo"]], axis=0).reshape(4, 1, C)

    kernel = functools.partial(
        _fused_attention_kernel,
        group_elems=float((C // num_groups) * S), eps=eps, m=m)

    out = pl.pallas_call(
        kernel,
        out_shape=jax.ShapeDtypeStruct((B, S, C), jnp.float32),
        grid=(B,),
        in_specs=[
            pl.BlockSpec((1, C, S), lambda b: (b, 0, 0)),       # x (channel-major)
            pl.BlockSpec((1, S, C), lambda b: (b, 0, 0)),       # x (residual frame)
            pl.BlockSpec((C, 1), lambda b: (0, 0)),             # gamma
            pl.BlockSpec((C, 1), lambda b: (0, 0)),             # beta
            pl.BlockSpec((C, C), lambda b: (0, 0)),             # group mask
            pl.BlockSpec((m, S, C), lambda b: (0, 0, 0)),       # selection mats
            pl.BlockSpec((4, C, C), lambda b: (0, 0, 0)),       # packed W^T
            pl.BlockSpec((4, 1, C), lambda b: (0, 0, 0)),       # packed biases
        ],
        out_specs=pl.BlockSpec((1, S, C), lambda b: (b, 0, 0)),
        compiler_params=pltpu.CompilerParams(
            dimension_semantics=("parallel",)),
    )(x3, xres, params["gn_w"].reshape(C, 1), params["gn_b"].reshape(C, 1),
      mask, sel, w_all, b_all)

    # (B, S, C) holds the same row-major bytes as the PyTorch (B, C, S) result,
    # so the final .view(init_input) is a flat reshape.
    return out.reshape(B, C, H, W)


# ---------------------------- pure-JAX reference ------------------------------
def attention_reference(x, params, num_groups, eps=1e-5):
    B, C, H, W = x.shape
    S = H * W
    hp = lax.Precision.HIGHEST
    x3 = x.reshape(B, C, S)
    xg = x3.reshape(B, num_groups, C // num_groups, S)
    mean = xg.mean(axis=(2, 3), keepdims=True)
    var = xg.var(axis=(2, 3), keepdims=True)
    xn = ((xg - mean) / jnp.sqrt(var + eps)).reshape(B, C, S)
    xn = xn * params["gn_w"][None, :, None] + params["gn_b"][None, :, None]
    xn2 = jnp.transpose(xn, (0, 2, 1)).reshape(-1, C)
    q = (jnp.dot(xn2, params["wq"].T, precision=hp) + params["bq"]).reshape(B, C, S)
    k = (jnp.dot(xn2, params["wk"].T, precision=hp) + params["bk"]).reshape(B, C, S)
    v = (jnp.dot(xn2, params["wv"].T, precision=hp) + params["bv"]).reshape(B, C, S)
    scores = (1.0 / math.sqrt(C)) * jnp.einsum("bcs,bds->bcd", q, k, precision=hp)
    weights = jax.nn.softmax(scores, axis=-1)
    attn = jnp.einsum("bcd,bds->bcs", weights, v, precision=hp)
    attn2 = jnp.transpose(attn, (0, 2, 1)).reshape(-1, C)
    out = (jnp.dot(attn2, params["wo"].T, precision=hp) + params["bo"]).reshape(B, C, S)
    return (x3 + out).reshape(B, C, H, W)


# ------------------------------------ main ------------------------------------
if __name__ == "__main__":
    B, C, H, W = 2, 32, 8, 8
    NORM_GROUPS = 8          # heads=1 (unused by the PyTorch forward)

    key = jax.random.PRNGKey(0)
    ks = jax.random.split(key, 11)
    params = {
        "gn_w": 1.0 + 0.1 * jax.random.normal(ks[0], (C,), jnp.float32),
        "gn_b": 0.1 * jax.random.normal(ks[1], (C,), jnp.float32),
        "wq": jax.random.normal(ks[2], (C, C), jnp.float32) / math.sqrt(C),
        "bq": 0.1 * jax.random.normal(ks[3], (C,), jnp.float32),
        "wk": jax.random.normal(ks[4], (C, C), jnp.float32) / math.sqrt(C),
        "bk": 0.1 * jax.random.normal(ks[5], (C,), jnp.float32),
        "wv": jax.random.normal(ks[6], (C, C), jnp.float32) / math.sqrt(C),
        "bv": 0.1 * jax.random.normal(ks[7], (C,), jnp.float32),
        "wo": jax.random.normal(ks[8], (C, C), jnp.float32) / math.sqrt(C),
        "bo": 0.1 * jax.random.normal(ks[9], (C,), jnp.float32),
    }
    x = jax.random.normal(ks[10], (B, C, H, W), jnp.float32)

    out = jax.block_until_ready(attention_forward(x, params, NORM_GROUPS))
    ref = jax.block_until_ready(attention_reference(x, params, NORM_GROUPS))

    max_err = float(jnp.max(jnp.abs(out - ref)))
    assert out.shape == (B, C, H, W) and max_err < 1e-2, f"max_err={max_err}"
    print("KERNEL_OK")
</pallas_src>

<mosaic_0001>
module attributes {stable_mosaic.version = 11 : i64} {
  func.func @_fused_attention_kernel(%arg0: i32, %arg1: memref<1x32x64xf32, #tpu.memory_space<vmem>>, %arg2: memref<1x64x32xf32, #tpu.memory_space<vmem>>, %arg3: memref<32x1xf32, #tpu.memory_space<vmem>>, %arg4: memref<32x1xf32, #tpu.memory_space<vmem>>, %arg5: memref<32x32xf32, #tpu.memory_space<vmem>>, %arg6: memref<2x64x32xf32, #tpu.memory_space<vmem>>, %arg7: memref<4x32x32xf32, #tpu.memory_space<vmem>>, %arg8: memref<4x1x32xf32, #tpu.memory_space<vmem>>, %arg9: memref<1x64x32xf32, #tpu.memory_space<vmem>>) attributes {dimension_semantics = [#tpu.dimension_semantics<parallel>], iteration_bounds = array<i64: 2>, scalar_prefetch = 0 : i64, scratch_operands = 0 : i64, tpu.core_type = #tpu.core_type<tc>, window_params = [{transform_indices = @transform_0, window_bounds = array<i64: 1, 32, 64>}, {transform_indices = @transform_1, window_bounds = array<i64: 1, 64, 32>}, {pipeline_mode = #tpu.pipeline_mode<synchronous>, transform_indices = @transform_2, window_bounds = array<i64: 32, 1>}, {pipeline_mode = #tpu.pipeline_mode<synchronous>, transform_indices = @transform_3, window_bounds = array<i64: 32, 1>}, {pipeline_mode = #tpu.pipeline_mode<synchronous>, transform_indices = @transform_4, window_bounds = array<i64: 32, 32>}, {pipeline_mode = #tpu.pipeline_mode<synchronous>, transform_indices = @transform_5, window_bounds = array<i64: 2, 64, 32>}, {pipeline_mode = #tpu.pipeline_mode<synchronous>, transform_indices = @transform_6, window_bounds = array<i64: 4, 32, 32>}, {pipeline_mode = #tpu.pipeline_mode<synchronous>, transform_indices = @transform_7, window_bounds = array<i64: 4, 1, 32>}, {transform_indices = @transform_8, window_bounds = array<i64: 1, 64, 32>}]} {
    %c0 = arith.constant 0 : index
    %c0_0 = arith.constant 0 : index
    %c0_1 = arith.constant 0 : index
    %0 = vector.load %arg1[%c0, %c0_0, %c0_1] : memref<1x32x64xf32, #tpu.memory_space<vmem>>, vector<1x32x64xf32>
    %1 = vector.shape_cast %0 : vector<1x32x64xf32> to vector<32x64xf32>
    %cst = arith.constant dense<0.000000e+00> : vector<32xf32>
    %2 = vector.multi_reduction <add>, %1, %cst [1] : vector<32x64xf32> to vector<32xf32>
    %3 = vector.shape_cast %2 : vector<32xf32> to vector<32x1xf32>
    %4 = arith.mulf %1, %1 : vector<32x64xf32>
    %cst_2 = arith.constant dense<0.000000e+00> : vector<32xf32>
    %5 = vector.multi_reduction <add>, %4, %cst_2 [1] : vector<32x64xf32> to vector<32xf32>
    %6 = vector.shape_cast %5 : vector<32xf32> to vector<32x1xf32>
    %c0_3 = arith.constant 0 : index
    %c0_4 = arith.constant 0 : index
    %7 = vector.load %arg5[%c0_3, %c0_4] : memref<32x32xf32, #tpu.memory_space<vmem>>, vector<32x32xf32>
    %cst_5 = arith.constant dense<0.000000e+00> : vector<32x1xf32>
    %8 = tpu.matmul %7, %3, %cst_5 {dimension_numbers = #tpu.dot_dimension_numbers<[1], [0], [0], [1], [0, 0, 1, 1], [], []>} : vector<32x32xf32>, vector<32x1xf32>, vector<32x1xf32> -> vector<32x1xf32>
    %cst_6 = arith.constant dense<0.000000e+00> : vector<32x1xf32>
    %9 = tpu.matmul %7, %6, %cst_6 {dimension_numbers = #tpu.dot_dimension_numbers<[1], [0], [0], [1], [0, 0, 1, 1], [], []>} : vector<32x32xf32>, vector<32x1xf32>, vector<32x1xf32> -> vector<32x1xf32>
    %cst_7 = arith.constant 2.560000e+02 : f32
    %10 = vector.broadcast %cst_7 : f32 to vector<32x1xf32>
    %11 = arith.divf %8, %10 : vector<32x1xf32>
    %cst_8 = arith.constant 2.560000e+02 : f32
    %12 = vector.broadcast %cst_8 : f32 to vector<32x1xf32>
    %13 = arith.divf %9, %12 : vector<32x1xf32>
    %14 = arith.mulf %11, %11 : vector<32x1xf32>
    %15 = arith.subf %13, %14 : vector<32x1xf32>
    %cst_9 = arith.constant 0.000000e+00 : f32
    %16 = vector.broadcast %cst_9 : f32 to vector<32x1xf32>
    %17 = arith.maximumf %15, %16 : vector<32x1xf32>
    %cst_10 = arith.constant 9.99999974E-6 : f32
    %18 = vector.broadcast %cst_10 : f32 to vector<32x1xf32>
    %19 = arith.addf %17, %18 : vector<32x1xf32>
    %20 = math.rsqrt %19 : vector<32x1xf32>
    %21 = vector.broadcast %11 : vector<32x1xf32> to vector<32x64xf32>
    %22 = arith.subf %1, %21 : vector<32x64xf32>
    %23 = vector.broadcast %20 : vector<32x1xf32> to vector<32x64xf32>
    %24 = arith.mulf %22, %23 : vector<32x64xf32>
    %c0_11 = arith.constant 0 : index
    %c0_12 = arith.constant 0 : index
    %25 = vector.load %arg3[%c0_11, %c0_12] : memref<32x1xf32, #tpu.memory_space<vmem>>, vector<32x1xf32>
    %26 = vector.broadcast %25 : vector<32x1xf32> to vector<32x64xf32>
    %27 = arith.mulf %24, %26 : vector<32x64xf32>
    %c0_13 = arith.constant 0 : index
    %c0_14 = arith.constant 0 : index
    %28 = vector.load %arg4[%c0_13, %c0_14] : memref<32x1xf32, #tpu.memory_space<vmem>>, vector<32x1xf32>
    %29 = vector.broadcast %28 : vector<32x1xf32> to vector<32x64xf32>
    %30 = arith.addf %27, %29 : vector<32x64xf32>
    %c0_15 = arith.constant 0 : index
    %c0_16 = arith.constant 0 : index
    %c0_17 = arith.constant 0 : index
    %31 = vector.load %arg7[%c0_15, %c0_16, %c0_17] : memref<4x32x32xf32, #tpu.memory_space<vmem>>, vector<1x32x32xf32>
    %32 = vector.shape_cast %31 : vector<1x32x32xf32> to vector<32x32xf32>
    %c1 = arith.constant 1 : index
    %c0_18 = arith.constant 0 : index
    %c0_19 = arith.constant 0 : index
    %33 = vector.load %arg7[%c1, %c0_18, %c0_19] : memref<4x32x32xf32, #tpu.memory_space<vmem>>, vector<1x32x32xf32>
    %34 = vector.shape_cast %33 : vector<1x32x32xf32> to vector<32x32xf32>
    %c2 = arith.constant 2 : index
    %c0_20 = arith.constant 0 : index
    %c0_21 = arith.constant 0 : index
    %35 = vector.load %arg7[%c2, %c0_20, %c0_21] : memref<4x32x32xf32, #tpu.memory_space<vmem>>, vector<1x32x32xf32>
    %36 = vector.shape_cast %35 : vector<1x32x32xf32> to vector<32x32xf32>
    %c3 = arith.constant 3 : index
    %c0_22 = arith.constant 0 : index
    %c0_23 = arith.constant 0 : index
    %37 = vector.load %arg7[%c3, %c0_22, %c0_23] : memref<4x32x32xf32, #tpu.memory_space<vmem>>, vector<1x32x32xf32>
    %38 = vector.shape_cast %37 : vector<1x32x32xf32> to vector<32x32xf32>
    %c0_24 = arith.constant 0 : index
    %c0_25 = arith.constant 0 : index
    %c0_26 = arith.constant 0 : index
    %39 = vector.load %arg8[%c0_24, %c0_25, %c0_26] : memref<4x1x32xf32, #tpu.memory_space<vmem>>, vector<1x1x32xf32>
    %40 = vector.shape_cast %39 : vector<1x1x32xf32> to vector<1x32xf32>
    %c1_27 = arith.constant 1 : index
    %c0_28 = arith.constant 0 : index
    %c0_29 = arith.constant 0 : index
    %41 = vector.load %arg8[%c1_27, %c0_28, %c0_29] : memref<4x1x32xf32, #tpu.memory_space<vmem>>, vector<1x1x32xf32>
    %42 = vector.shape_cast %41 : vector<1x1x32xf32> to vector<1x32xf32>
    %c2_30 = arith.constant 2 : index
    %c0_31 = arith.constant 0 : index
    %c0_32 = arith.constant 0 : index
    %43 = vector.load %arg8[%c2_30, %c0_31, %c0_32] : memref<4x1x32xf32, #tpu.memory_space<vmem>>, vector<1x1x32xf32>
    %44 = vector.shape_cast %43 : vector<1x1x32xf32> to vector<1x32xf32>
    %c3_33 = arith.constant 3 : index
    %c0_34 = arith.constant 0 : index
    %c0_35 = arith.constant 0 : index
    %45 = vector.load %arg8[%c3_33, %c0_34, %c0_35] : memref<4x1x32xf32, #tpu.memory_space<vmem>>, vector<1x1x32xf32>
    %46 = vector.shape_cast %45 : vector<1x1x32xf32> to vector<1x32xf32>
    %cst_36 = arith.constant 0.000000e+00 : f32
    %47 = vector.broadcast %cst_36 : f32 to vector<32x32xf32>
    %c0_37 = arith.constant 0 : index
    %c0_38 = arith.constant 0 : index
    %c0_39 = arith.constant 0 : index
    %48 = vector.load %arg6[%c0_37, %c0_38, %c0_39] : memref<2x64x32xf32, #tpu.memory_space<vmem>>, vector<1x64x32xf32>
    %49 = vector.shape_cast %48 : vector<1x64x32xf32> to vector<64x32xf32>
    %cst_40 = arith.constant dense<0.000000e+00> : vector<32x32xf32>
    %50 = tpu.matmul %30, %49, %cst_40 {dimension_numbers = #tpu.dot_dimension_numbers<[1], [0], [0], [1], [0, 0, 1, 1], [], []>} : vector<32x64xf32>, vector<64x32xf32>, vector<32x32xf32> -> vector<32x32xf32>
    %cst_41 = arith.constant dense<0.000000e+00> : vector<32x32xf32>
    %51 = tpu.matmul %50, %32, %cst_41 {dimension_numbers = #tpu.dot_dimension_numbers<[0], [0], [1], [1], [0, 1, 1, 1], [], []>} : vector<32x32xf32>, vector<32x32xf32>, vector<32x32xf32> -> vector<32x32xf32>
    %52 = vector.broadcast %40 : vector<1x32xf32> to vector<32x32xf32>
    %53 = arith.addf %51, %52 : vector<32x32xf32>
    %cst_42 = arith.constant dense<0.000000e+00> : vector<32x32xf32>
    %54 = tpu.matmul %50, %34, %cst_42 {dimension_numbers = #tpu.dot_dimension_numbers<[0], [0], [1], [1], [0, 1, 1, 1], [], []>} : vector<32x32xf32>, vector<32x32xf32>, vector<32x32xf32> -> vector<32x32xf32>
    %55 = vector.broadcast %42 : vector<1x32xf32> to vector<32x32xf32>
    %56 = arith.addf %54, %55 : vector<32x32xf32>
    %cst_43 = arith.constant dense<0.000000e+00> : vector<32x32xf32>
    %57 = tpu.matmul %53, %56, %cst_43 {dimension_numbers = #tpu.dot_dimension_numbers<[1], [1], [0], [0], [0, 0, 1, 0], [], []>} : vector<32x32xf32>, vector<32x32xf32>, vector<32x32xf32> -> vector<32x32xf32>
    %58 = arith.addf %47, %57 : vector<32x32xf32>
    %c1_44 = arith.constant 1 : index
    %c0_45 = arith.constant 0 : index
    %c0_46 = arith.constant 0 : index
    %59 = vector.load %arg6[%c1_44, %c0_45, %c0_46] : memref<2x64x32xf32, #tpu.memory_space<vmem>>, vector<1x64x32xf32>
    %60 = vector.shape_cast %59 : vector<1x64x32xf32> to vector<64x32xf32>
    %cst_47 = arith.constant dense<0.000000e+00> : vector<32x32xf32>
    %61 = tpu.matmul %30, %60, %cst_47 {dimension_numbers = #tpu.dot_dimension_numbers<[1], [0], [0], [1], [0, 0, 1, 1], [], []>} : vector<32x64xf32>, vector<64x32xf32>, vector<32x32xf32> -> vector<32x32xf32>
    %cst_48 = arith.constant dense<0.000000e+00> : vector<32x32xf32>
    %62 = tpu.matmul %61, %32, %cst_48 {dimension_numbers = #tpu.dot_dimension_numbers<[0], [0], [1], [1], [0, 1, 1, 1], [], []>} : vector<32x32xf32>, vector<32x32xf32>, vector<32x32xf32> -> vector<32x32xf32>
    %63 = vector.broadcast %40 : vector<1x32xf32> to vector<32x32xf32>
    %64 = arith.addf %62, %63 : vector<32x32xf32>
    %cst_49 = arith.constant dense<0.000000e+00> : vector<32x32xf32>
    %65 = tpu.matmul %61, %34, %cst_49 {dimension_numbers = #tpu.dot_dimension_numbers<[0], [0], [1], [1], [0, 1, 1, 1], [], []>} : vector<32x32xf32>, vector<32x32xf32>, vector<32x32xf32> -> vector<32x32xf32>
    %66 = vector.broadcast %42 : vector<1x32xf32> to vector<32x32xf32>
    %67 = arith.addf %65, %66 : vector<32x32xf32>
    %cst_50 = arith.constant dense<0.000000e+00> : vector<32x32xf32>
    %68 = tpu.matmul %64, %67, %cst_50 {dimension_numbers = #tpu.dot_dimension_numbers<[1], [1], [0], [0], [0, 0, 1, 0], [], []>} : vector<32x32xf32>, vector<32x32xf32>, vector<32x32xf32> -> vector<32x32xf32>
    %69 = arith.addf %58, %68 : vector<32x32xf32>
    %cst_51 = arith.constant dense<0xFF800000> : vector<32xf32>
    %70 = vector.multi_reduction <maximumf>, %69, %cst_51 [1] : vector<32x32xf32> to vector<32xf32>
    %71 = vector.shape_cast %70 : vector<32xf32> to vector<32x1xf32>
    %72 = vector.broadcast %71 : vector<32x1xf32> to vector<32x32xf32>
    %73 = arith.subf %69, %72 : vector<32x32xf32>
    %74 = math.exp %73 : vector<32x32xf32>
    %cst_52 = arith.constant dense<0.000000e+00> : vector<32xf32>
    %75 = vector.multi_reduction <add>, %74, %cst_52 [1] : vector<32x32xf32> to vector<32xf32>
    %76 = vector.shape_cast %75 : vector<32xf32> to vector<32x1xf32>
    %77 = tpu.reciprocal %76 {approx = true} : vector<32x1xf32> -> vector<32x1xf32>
    %78 = vector.broadcast %77 : vector<32x1xf32> to vector<32x32xf32>
    %79 = arith.mulf %74, %78 : vector<32x32xf32>
    %cst_53 = arith.constant dense<0.000000e+00> : vector<32x32xf32>
    %80 = tpu.matmul %50, %36, %cst_53 {dimension_numbers = #tpu.dot_dimension_numbers<[0], [0], [1], [1], [0, 1, 1, 1], [], []>} : vector<32x32xf32>, vector<32x32xf32>, vector<32x32xf32> -> vector<32x32xf32>
    %81 = vector.broadcast %44 : vector<1x32xf32> to vector<32x32xf32>
    %82 = arith.addf %80, %81 : vector<32x32xf32>
    %cst_54 = arith.constant dense<0.000000e+00> : vector<32x32xf32>
    %83 = tpu.matmul %79, %82, %cst_54 {dimension_numbers = #tpu.dot_dimension_numbers<[1], [0], [0], [1], [0, 0, 1, 1], [], []>} : vector<32x32xf32>, vector<32x32xf32>, vector<32x32xf32> -> vector<32x32xf32>
    %cst_55 = arith.constant dense<0.000000e+00> : vector<32x32xf32>
    %84 = tpu.matmul %83, %38, %cst_55 {dimension_numbers = #tpu.dot_dimension_numbers<[0], [0], [1], [1], [0, 1, 1, 1], [], []>} : vector<32x32xf32>, vector<32x32xf32>, vector<32x32xf32> -> vector<32x32xf32>
    %85 = vector.broadcast %46 : vector<1x32xf32> to vector<32x32xf32>
    %86 = arith.addf %84, %85 : vector<32x32xf32>
    %c0_56 = arith.constant 0 : index
    %c0_57 = arith.constant 0 : index
    %c0_58 = arith.constant 0 : index
    %87 = vector.load %arg2[%c0_56, %c0_57, %c0_58] : memref<1x64x32xf32, #tpu.memory_space<vmem>>, vector<1x32x32xf32>
    %88 = vector.shape_cast %87 : vector<1x32x32xf32> to vector<32x32xf32>
    %89 = arith.addf %86, %88 : vector<32x32xf32>
    %c0_59 = arith.constant 0 : index
    %c0_60 = arith.constant 0 : index
    %c0_61 = arith.constant 0 : index
    %90 = vector.load %arg9[%c0_59, %c0_60, %c0_61] : memref<1x64x32xf32, #tpu.memory_space<vmem>>, vector<1x32x32xf32>
    %91 = vector.shape_cast %90 : vector<1x32x32xf32> to vector<32x32xf32>
    %92 = vector.shape_cast %89 : vector<32x32xf32> to vector<1x32x32xf32>
    tpu.vector_store %arg9[%c0_59, %c0_60, %c0_61], %92 {strides = array<i32>} : memref<1x64x32xf32, #tpu.memory_space<vmem>>, vector<1x32x32xf32>,
    %cst_62 = arith.constant dense<0.000000e+00> : vector<32x32xf32>
    %93 = tpu.matmul %61, %36, %cst_62 {dimension_numbers = #tpu.dot_dimension_numbers<[0], [0], [1], [1], [0, 1, 1, 1], [], []>} : vector<32x32xf32>, vector<32x32xf32>, vector<32x32xf32> -> vector<32x32xf32>
    %94 = vector.broadcast %44 : vector<1x32xf32> to vector<32x32xf32>
    %95 = arith.addf %93, %94 : vector<32x32xf32>
    %cst_63 = arith.constant dense<0.000000e+00> : vector<32x32xf32>
    %96 = tpu.matmul %79, %95, %cst_63 {dimension_numbers = #tpu.dot_dimension_numbers<[1], [0], [0], [1], [0, 0, 1, 1], [], []>} : vector<32x32xf32>, vector<32x32xf32>, vector<32x32xf32> -> vector<32x32xf32>
    %cst_64 = arith.constant dense<0.000000e+00> : vector<32x32xf32>
    %97 = tpu.matmul %96, %38, %cst_64 {dimension_numbers = #tpu.dot_dimension_numbers<[0], [0], [1], [1], [0, 1, 1, 1], [], []>} : vector<32x32xf32>, vector<32x32xf32>, vector<32x32xf32> -> vector<32x32xf32>
    %98 = vector.broadcast %46 : vector<1x32xf32> to vector<32x32xf32>
    %99 = arith.addf %97, %98 : vector<32x32xf32>
    %c0_65 = arith.constant 0 : index
    %c32 = arith.constant 32 : index
    %c0_66 = arith.constant 0 : index
    %100 = vector.load %arg2[%c0_65, %c32, %c0_66] : memref<1x64x32xf32, #tpu.memory_space<vmem>>, vector<1x32x32xf32>
    %101 = vector.shape_cast %100 : vector<1x32x32xf32> to vector<32x32xf32>
    %102 = arith.addf %99, %101 : vector<32x32xf32>
    %c0_67 = arith.constant 0 : index
    %c32_68 = arith.constant 32 : index
    %c0_69 = arith.constant 0 : index
    %103 = vector.load %arg9[%c0_67, %c32_68, %c0_69] : memref<1x64x32xf32, #tpu.memory_space<vmem>>, vector<1x32x32xf32>
    %104 = vector.shape_cast %103 : vector<1x32x32xf32> to vector<32x32xf32>
    %105 = vector.shape_cast %102 : vector<32x32xf32> to vector<1x32x32xf32>
    tpu.vector_store %arg9[%c0_67, %c32_68, %c0_69], %105 {strides = array<i32>} : memref<1x64x32xf32, #tpu.memory_space<vmem>>, vector<1x32x32xf32>,
    return
  }
  func.func @transform_0(%arg0: i32) -> (i32, i32, i32) {
    %c0_i32 = arith.constant 0 : i32
    %c0_i32_0 = arith.constant 0 : i32
    %c0_i32_1 = arith.constant 0 : i32
    return %arg0, %c0_i32, %c0_i32_0 : i32, i32, i32
  }
  func.func @transform_1(%arg0: i32) -> (i32, i32, i32) {
    %c0_i32 = arith.constant 0 : i32
    %c0_i32_0 = arith.constant 0 : i32
    %c0_i32_1 = arith.constant 0 : i32
    return %arg0, %c0_i32, %c0_i32_0 : i32, i32, i32
  }
  func.func @transform_2(%arg0: i32) -> (i32, i32) {
    %c0_i32 = arith.constant 0 : i32
    %c0_i32_0 = arith.constant 0 : i32
    %c0_i32_1 = arith.constant 0 : i32
    return %c0_i32, %c0_i32_0 : i32, i32
  }
  func.func @transform_3(%arg0: i32) -> (i32, i32) {
    %c0_i32 = arith.constant 0 : i32
    %c0_i32_0 = arith.constant 0 : i32
    %c0_i32_1 = arith.constant 0 : i32
    return %c0_i32, %c0_i32_0 : i32, i32
  }
  func.func @transform_4(%arg0: i32) -> (i32, i32) {
    %c0_i32 = arith.constant 0 : i32
    %c0_i32_0 = arith.constant 0 : i32
    %c0_i32_1 = arith.constant 0 : i32
    return %c0_i32, %c0_i32_0 : i32, i32
  }
  func.func @transform_5(%arg0: i32) -> (i32, i32, i32) {
    %c0_i32 = arith.constant 0 : i32
    %c0_i32_0 = arith.constant 0 : i32
    %c0_i32_1 = arith.constant 0 : i32
    %c0_i32_2 = arith.constant 0 : i32
    return %c0_i32, %c0_i32_0, %c0_i32_1 : i32, i32, i32
  }
  func.func @transform_6(%arg0: i32) -> (i32, i32, i32) {
    %c0_i32 = arith.constant 0 : i32
    %c0_i32_0 = arith.constant 0 : i32
    %c0_i32_1 = arith.constant 0 : i32
    %c0_i32_2 = arith.constant 0 : i32
    return %c0_i32, %c0_i32_0, %c0_i32_1 : i32, i32, i32
  }
  func.func @transform_7(%arg0: i32) -> (i32, i32, i32) {
    %c0_i32 = arith.constant 0 : i32
    %c0_i32_0 = arith.constant 0 : i32
    %c0_i32_1 = arith.constant 0 : i32
    %c0_i32_2 = arith.constant 0 : i32
    return %c0_i32, %c0_i32_0, %c0_i32_1 : i32, i32, i32
  }
  func.func @transform_8(%arg0: i32) -> (i32, i32, i32) {
    %c0_i32 = arith.constant 0 : i32
    %c0_i32_0 = arith.constant 0 : i32
    %c0_i32_1 = arith.constant 0 : i32
    return %arg0, %c0_i32, %c0_i32_0 : i32, i32, i32
  }
}

</mosaic_0001>

<bundles_post_ra>
// kernel: tpu_custom_call.1
= control target key start
LH: loop header
LB: loop body
LE: loop exit
PB: predicated region body
PF: predicated region fallthrough
CT: control target
= control target key end

     0   :  { %s2900_s27 = smov 0   ;;  %s3306_s0 = inlined_call_operand.vmem [shape: f32[2,32,64], index: 0, kind: input, shape index: {}]   ;;  %s3307_s1 = inlined_call_operand.vmem [shape: f32[2,64,32], index: 1, kind: input, shape index: {}]   ;;  %s3308_s2 = inlined_call_operand.vmem [shape: f32[32,1], index: 2, kind: input, shape index: {}]   ;;  %s3309_s3 = inlined_call_operand.vmem [shape: f32[32,1], index: 3, kind: input, shape index: {}]   ;;  %s3310_s4 = inlined_call_operand.vmem [shape: f32[32,32], index: 4, kind: input, shape index: {}]   ;;  %s3311_s5 = inlined_call_operand.vmem [shape: f32[2,64,32], index: 5, kind: input, shape index: {}]   ;;  %s3312_s6 = inlined_call_operand.vmem [shape: f32[4,32,32], index: 6, kind: input, shape index: {}]   ;;  %s3313_s7 = inlined_call_operand.vmem [shape: f32[4,1,32], index: 7, kind: input, shape index: {}]   ;;  %s3314_s8 = inlined_call_operand.vmem [shape: f32[2,64,32], index: 8, kind: output, shape index: {}]  }
   0x1 LB: > { %s2319_s28 = sadd.s32 4294967295, %s2852_s27   ;;  %p2323_p0 = scmp.ge.s32.totalorder %s2852_s27, 1  ;;  %s2852_s27 = sphi %s2900_s27, %s18_s27  }
   0x2   : > { %p272_p1 = scmp.lt.s32.totalorder %s2852_s27, 3 }
   0x4   : > { %p273_p2 = pnand %p2323_p0, %p272_p1 }
   0x5   : > { %p311_p3 = scmp.lt.s32.totalorder (!%p273_p2), %s2319_s28, 1 }
   0x6   : > { %276 = sbr.rel (%p273_p2) target bundleno = 2465 (0x9a1), region = 52 }
   0xb   : > { %s3316_s28 = smov (!%p311_p3, %s2319_s28), 1  ;;  %vm330_vm0 = vcmask 523264   ;;  %v359_v16 = vld [vmem:[%s3310_s4] sm:$0xff]  ;;  %vm363_vm1 = vcmask 261120   ;;  %v2854_v18 = vmov 0   ;;  %v624_v19 = vld [vmem:[%s3308_s2 + $0x8] sm:$0xff] }
   0xc   : > { %s2431_s29 = sshll.u32 %s3316_s28, 5  ;;  %2578 = vmatprep.mubr.msk.f32.mxu0 %vm363_vm1, %v359_v16  ;;  %2592 = vmatprep.mubr.msk.f32.mxu1 %vm363_vm1, %v359_v16  ;;  %v623_v17 = vld [vmem:[%s3308_s2] sm:$0xff]  ;;  %v360_v26 = vld [vmem:[%s3310_s4 + $0x8] sm:$0xff]  ;;  %v361_v27 = vld [vmem:[%s3310_s4 + $0x10] sm:$0xff]  ;;  %s2432_s25 = sshll.u32 %s3316_s28, 6 }
   0xd   : > { %s315_s10 = scalar_lea.vmem %s3306_s0, %s2431_s29  ;;  %2820 = vset.pattern.permute.xlu1 %v2854_v18  ;;  %2821 = vset.pattern.permute.xlu0 %v2854_v18  ;;  %v362_v30 = vld [vmem:[%s3310_s4 + $0x18] sm:$0xff]  ;;  %v651_v31 = vld [vmem:[%s3309_s3] sm:$0xff]  ;;  %v625_v36 = vld [vmem:[%s3308_s2 + $0x10] sm:$0xff]  ;;  %s3265_s30 = scalar_lea.vmem %s3307_s1, %s2432_s25 }
   0xe   : > { %v2914_v0 = vld [vmem:[%s315_s10 + $0x18] sm:$0xff]  ;;  %v2916_v1 = vld [vmem:[%s315_s10 + $0x8] sm:$0xff]  ;;  %v2918_v2 = vld [vmem:[%s315_s10 + $0x10] sm:$0xff]  ;;  %s3274_s28 = scalar_lea.vmem %s3314_s8, %s2432_s25 }
   0xf   : > { %v340_v3 = vsel %vm330_vm0, %v2914_v0, 0.0  ;;  %v334_v4 = vsel %vm330_vm0, %v2916_v1, 0.0  ;;  %v346_v5 = vmul.f32 %v2914_v0, %v2914_v0  ;;  %v337_v6 = vsel %vm330_vm0, %v2918_v2, 0.0  ;;  %v2931_v9 = vld [vmem:[%s315_s10] sm:$0xff]  ;;  %v652_v41 = vld [vmem:[%s3309_s3 + $0x8] sm:$0xff]  ;;  %v626_v51 = vld [vmem:[%s3308_s2 + $0x18] sm:$0xff] }
  0x10   : > { %341 = vadd.xlane.f32.xlu0 %v340_v3  ;;  %335 = vadd.xlane.f32.xlu1 %v334_v4  ;;  %v345_v8 = vmul.f32 %v2918_v2, %v2918_v2  ;;  %v331_v11 = vsel %vm330_vm0, %v2931_v9, 0.0  ;;  %v344_v12 = vmul.f32 %v2916_v1, %v2916_v1  ;;  %v343_v13 = vmul.f32 %v2931_v9, %v2931_v9  ;;  %v712_v56 = vld [vmem:[%s3311_s5 + $0x38] sm:$0xff]  ;;  %v711_v57 = vld [vmem:[%s3311_s5 + $0x30] sm:$0xff]  ;;  %v710_v63 = vld [vmem:[%s3311_s5 + $0x28] sm:$0xff] }
  0x11   : > { %v356_v7 = vsel %vm330_vm0, %v346_v5, 0.0  ;;  %v654_v3 = vld [vmem:[%s3309_s3 + $0x18] sm:$0xff] }
  0x12   : > { %v353_v10 = vsel %vm330_vm0, %v345_v8, 0.0  ;;  %v350_v14 = vsel %vm330_vm0, %v344_v12, 0.0  ;;  %v347_v15 = vsel %vm330_vm0, %v343_v13, 0.0  ;;  %v708_v12 = vld [vmem:[%s3311_s5 + $0x18] sm:$0xff] }
  0x14   : > { %338 = vadd.xlane.f32.xlu0 %v337_v6  ;;  %357 = vadd.xlane.f32.xlu1 %v356_v7 }
  0x18   : > { %354 = vadd.xlane.f32.xlu0 %v353_v10  ;;  %332 = vadd.xlane.f32.xlu1 %v331_v11  ;;  %v709_v11 = vld [vmem:[%s3311_s5 + $0x20] sm:$0xff] }
  0x1c   : > { %351 = vadd.xlane.f32.xlu0 %v350_v14  ;;  %348 = vadd.xlane.f32.xlu1 %v347_v15  ;;  %v707_v14 = vld [vmem:[%s3311_s5 + $0x10] sm:$0xff]  ;;  %v706_v15 = vld [vmem:[%s3311_s5 + $0x8] sm:$0xff] }
  0x2d   : > { %629 = vperm.xlu1 %2820, %v623_v17   ;;  %v705_v17 = vld [vmem:[%s3311_s5] sm:$0xff] }
  0x31   : > { %634 = vperm.xlu1 %2820, %v624_v19   ;;  %v2374_v19 = vld [vmem:[%s3311_s5 + $0x78] sm:$0xff] }
  0x32   : > { %657 = vperm.xlu0 %2821, %v651_v31  }
  0x99   : > { %v342_v20 = vpop.xlane.xlu0 %341  ;;  %v336_v21 = vpop.xlane.xlu1 %335 }
  0x9a   : > { %2570 = vmatprep.subr.mxu0 %v342_v20 }
  0x9b   : > { %2571 = vmatpush3.msra.mxu0 %v342_v20 }
  0x9d   : > { %v339_v22 = vpop.xlane.xlu0 %338  ;;  %v358_v23 = vpop.xlane.xlu1 %357 }
  0x9e   : > { %2572 = vmatprep.subr.mxu0 %v339_v22  ;;  %2584 = vmatprep.subr.mxu1 %v358_v23 }
  0x9f   : > { %2573 = vmatpush3.msra.mxu0 %v339_v22  ;;  %2585 = vmatpush3.msra.mxu1 %v358_v23 }
  0xa0   : > { %2574 = vmatprep.subr.mxu0 %v336_v21 }
  0xa1   : > { %v355_v24 = vpop.xlane.xlu0 %354  ;;  %2575 = vmatpush3.msra.mxu0 %v336_v21  ;;  %v333_v25 = vpop.xlane.xlu1 %332  ;;  %v653_v21 = vld [vmem:[%s3309_s3 + $0x10] sm:$0xff] }
  0xa2   : > { %2576 = vmatprep.subr.mxu0 %v333_v25  ;;  %2586 = vmatprep.subr.mxu1 %v355_v24 }
  0xa3   : > { %2577 = vmatpush3.msra.mxu0 %v333_v25  ;;  %2587 = vmatpush3.msra.mxu1 %v355_v24 }
  0xa4   : > { %2579 = vmatmul.mubr.msk.f32.vlgmr.msra.gmra.mxu0 %vm363_vm1, %v360_v26  ;;  %2598 = vmatprep.subr.mxu0 %v712_v56 }
  0xa5   : > { %v352_v28 = vpop.xlane.xlu0 %351  ;;  %v349_v29 = vpop.xlane.xlu1 %348  ;;  %2581 = vmatprep.mubr.msk.f32.mxu0 %vm363_vm1, %v361_v27  ;;  %2599 = vmatpush3.msra.mxu0 %v712_v56  ;;  %v2367_v56 = vld [vmem:[%s3311_s5 + $0x40] sm:$0xff] }
  0xa6   : > { %2588 = vmatprep.subr.mxu1 %v352_v28  ;;  %2600 = vmatprep.subr.mxu0 %v711_v57 }
  0xa7   : > { %2589 = vmatpush3.msra.mxu1 %v352_v28  ;;  %2601 = vmatpush3.msra.mxu0 %v711_v57  ;;  %v682_v57 = vld [vmem:[%s3312_s6 + $0x18] sm:$0xff] }
  0xa8   : > { %2590 = vmatprep.subr.mxu1 %v349_v29  ;;  %2582 = vmatmul.mubr.msk.f32.gmra.mxu0 %vm363_vm1, %v362_v30 }
  0xa9   : > { %2591 = vmatpush3.msra.mxu1 %v349_v29  ;;  %2602 = vmatprep.subr.mxu0 %v710_v63  ;;  %v630_v22 = vpop.permute.xlu1 %629 }
  0xaa   : > { %2593 = vmatmul.mubr.msk.f32.vlgmr.msra.gmra.mxu1 %vm363_vm1, %v360_v26  ;;  %2603 = vmatpush3.msra.mxu0 %v710_v63  ;;  %v2341_v63 = vld [vmem:[%s3312_s6 + $0x38] sm:$0xff] }
  0xab   : > { %2595 = vmatprep.mubr.msk.f32.mxu1 %vm363_vm1, %v361_v27  ;;  %2604 = vmatprep.subr.mxu0 %v709_v11 }
  0xac   : > { %2605 = vmatpush3.msra.mxu0 %v709_v11  ;;  %2620 = vmatprep.subr.mxu1 %v682_v57 }
  0xad   : > { %2606 = vmatprep.subr.mxu0 %v708_v12  ;;  %v635_v23 = vpop.permute.xlu1 %634  ;;  %v658_v27 = vpop.permute.xlu0 %657  ;;  %2621 = vmatpush3.msra.mxu1 %v682_v57 }
  0xae   : > { %2596 = vmatmul.mubr.msk.f32.gmra.mxu1 %vm363_vm1, %v362_v30  ;;  %2607 = vmatpush3.msra.mxu0 %v708_v12  ;;  %v2340_v12 = vld [vmem:[%s3312_s6 + $0x30] sm:$0xff] }
  0xaf   : > { %2608 = vmatprep.subr.mxu0 %v707_v14 }
  0xb0   : > { %2609 = vmatpush3.msra.mxu0 %v707_v14 }
  0xb1   : > { %2610 = vmatprep.subr.mxu0 %v706_v15 }
  0xb2   : > { %2611 = vmatpush3.msra.mxu0 %v706_v15  ;;  %v2338_v15 = vld [vmem:[%s3312_s6 + $0x20] sm:$0xff] }
  0xb3   : > { %2612 = vmatprep.subr.mxu0 %v705_v17 }
  0xb4   : > { %2613 = vmatpush3.msra.mxu0 %v705_v17 }
  0xb5   : > { %2648 = vmatprep.subr.mxu0 %v2374_v19 }
 0x164   : > { %v2580_v32 = vpop.f32.mrf.mxu0 }
 0x165   : > { %v548_v33 = vmul.f32 0.00390625, %v2580_v32 }
 0x166   : > { %v442_v34 = vpop.f32.mrf.mxu0 }
 0x167   : > { %582 = vperm.xlu1 %2820, %v548_v33   ;;  %v547_v35 = vmul.f32 0.00390625, %v442_v34  ;;  %v556_v38 = vmul.f32 %v548_v33, %v548_v33 }
 0x168   : > { %v2583_v37 = vpop.f32.mrf.mxu0 }
 0x169   : > { %577 = vperm.xlu0 %2821, %v547_v35   ;;  %v550_v43 = vmul.f32 0.00390625, %v2583_v37  ;;  %v555_v46 = vmul.f32 %v547_v35, %v547_v35 }
 0x16a   : > { %v2594_v39 = vpop.f32.mrf.mxu1  ;;  %v452_v40 = vpop.f32.mrf.mxu0 }
 0x16b   : > { %v552_v42 = vmul.f32 0.00390625, %v2594_v39  ;;  %639 = vperm.xlu1 %2820, %v625_v36   ;;  %v549_v44 = vmul.f32 0.00390625, %v452_v40  ;;  %v558_v48 = vmul.f32 %v550_v43, %v550_v43 }
 0x16c   : > { %v527_v45 = vpop.f32.mrf.mxu1 }
 0x16d   : > { %v560_v47 = vsub.f32 %v552_v42, %v556_v38  ;;  %v551_v49 = vmul.f32 0.00390625, %v527_v45  ;;  %662 = vperm.xlu0 %2821, %v652_v41   ;;  %v557_v54 = vmul.f32 %v549_v44, %v549_v44 }
 0x16e   : > { %v2597_v50 = vpop.f32.mrf.mxu1 }
 0x16f   : > { %v564_v52 = vmax.f32 %v560_v47, 0.0  ;;  %v559_v53 = vsub.f32 %v551_v49, %v555_v46  ;;  %592 = vperm.xlu1 %2820, %v550_v43   ;;  %v554_v55 = vmul.f32 0.00390625, %v2597_v50 }
 0x170   : > { %v537_v58 = vpop.f32.mrf.mxu1 }
 0x171   : > { %v568_v59 = vadd.f32 1e-05, %v564_v52  ;;  %v563_v60 = vmax.f32 %v559_v53, 0.0  ;;  %v562_v61 = vsub.f32 %v554_v55, %v558_v48  ;;  %v553_v62 = vmul.f32 0.00390625, %v537_v58  ;;  %644 = vperm.xlu0 %2821, %v626_v51   ;;  %v2371_v48 = vld [vmem:[%s3311_s5 + $0x60] sm:$0xff]  ;;  %v2370_v52 = vld [vmem:[%s3311_s5 + $0x58] sm:$0xff] }
 0x172   : > { %v2368_v55 = vld [vmem:[%s3311_s5 + $0x48] sm:$0xff]  ;;  %v681_v58 = vld [vmem:[%s3312_s6 + $0x10] sm:$0xff] }
 0x173   : > { %2822 = vrsqrt.f32 %v568_v59  ;;  %v567_v4 = vadd.f32 1e-05, %v563_v60  ;;  %v566_v5 = vmax.f32 %v562_v61, 0.0  ;;  %v561_v6 = vsub.f32 %v553_v62, %v557_v54  ;;  %587 = vperm.xlu1 %2820, %v549_v44   ;;  %v2369_v54 = vld [vmem:[%s3311_s5 + $0x50] sm:$0xff]  ;;  %2622 = vmatprep.subr.mxu1 %v681_v58  ;;  %v680_v59 = vld [vmem:[%s3312_s6 + $0x8] sm:$0xff]  ;;  %v679_v61 = vld [vmem:[%s3312_s6] sm:$0xff] }
 0x174   : > { %2623 = vmatpush3.msra.mxu1 %v681_v58 }
 0x175   : > { %v570_v7 = vadd.f32 1e-05, %v566_v5  ;;  %672 = vperm.xlu0 %2821, %v654_v3   ;;  %2824 = vrsqrt.f32 %v567_v4  ;;  %v565_v8 = vmax.f32 %v561_v6, 0.0  ;;  %2624 = vmatprep.subr.mxu1 %v680_v59 }
 0x176   : > { %2625 = vmatpush3.msra.mxu1 %v680_v59 }
 0x177   : > { %2826 = vrsqrt.f32 %v570_v7  ;;  %v569_v10 = vadd.f32 1e-05, %v565_v8  ;;  %2626 = vmatprep.subr.mxu1 %v679_v61 }
 0x178   : > { %2627 = vmatpush3.msra.mxu1 %v679_v61 }
 0x179   : > { %2828 = vrsqrt.f32 %v569_v10  ;;  %2634 = vmatprep.subr.mxu1 %v2341_v63 }
 0x180   : > { %v2823_v13 = vpop.eup %2822 }
 0x181   : > { %606 = vperm.xlu1 %2820, %v2823_v13   ;;  %v2339_v13 = vld [vmem:[%s3312_s6 + $0x28] sm:$0xff] }
 0x182   : > { %v2825_v16 = vpop.eup %2824 }
 0x184   : > { %v2827_v18 = vpop.eup %2826 }
 0x185   : > { %601 = vperm.xlu1 %2820, %v2825_v16  }
 0x186   : > { %v2829_v20 = vpop.eup %2828 }
 0x189   : > { %616 = vperm.xlu1 %2820, %v2827_v18  }
 0x18d   : > { %611 = vperm.xlu1 %2820, %v2829_v20  }
 0x191   : > { %667 = vperm.xlu1 %2820, %v653_v21  }
 0x1e2   : > { %v583_v24 = vpop.permute.xlu1 %582 }
 0x1e3   : > { %v596_v29 = vsub.f32 %v2916_v1, %v583_v24  ;;  %v2373_v1 = vld [vmem:[%s3311_s5 + $0x70] sm:$0xff] }
 0x1e4   : > { %v578_v30 = vpop.permute.xlu0 %577 }
 0x1e5   : > { %v595_v33 = vsub.f32 %v2931_v9, %v578_v30 }
 0x1e6   : > { %v640_v25 = vpop.permute.xlu1 %639 }
 0x1e8   : > { %v663_v35 = vpop.permute.xlu0 %662 }
 0x1ea   : > { %v593_v26 = vpop.permute.xlu1 %592 }
 0x1eb   : > { %v598_v39 = vsub.f32 %v2914_v0, %v593_v26  ;;  %v2372_v0 = vld [vmem:[%s3311_s5 + $0x68] sm:$0xff] }
 0x1ec   : > { %v645_v45 = vpop.permute.xlu0 %644 }
 0x1ee   : > { %v588_v28 = vpop.permute.xlu1 %587 }
 0x1ef   : > { %v597_v44 = vsub.f32 %v2918_v2, %v588_v28 }
 0x1f0   : > { %v673_v50 = vpop.permute.xlu0 %672 }
 0x1fc   : > { %v607_v31 = vpop.permute.xlu1 %606 }
 0x1fd   : > { %v620_v32 = vmul.f32 %v607_v31, %v596_v29  ;;  %v2362_v29 = vld [vmem:[%s3313_s7 + $0x1] ss:$0 sm:$0xff] }
 0x1ff   : > { %v648_v37 = vmul.f32 %v635_v23, %v620_v32 }
 0x200   : > { %v602_v34 = vpop.permute.xlu1 %601 }
 0x201   : > { %v619_v36 = vmul.f32 %v602_v34, %v595_v33  ;;  %v676_v42 = vadd.f32 %v663_v35, %v648_v37 }
 0x203   : > { %v647_v38 = vmul.f32 %v630_v22, %v619_v36  ;;  %v2357_v22 = vld [vmem:[%s3313_s7] ss:$0 sm:$0xff] }
 0x204   : > { %v617_v40 = vpop.permute.xlu1 %616 }
 0x205   : > { %v675_v41 = vadd.f32 %v658_v27, %v647_v38  ;;  %v622_v43 = vmul.f32 %v617_v40, %v598_v39 }
 0x207   : > { %2614 = vmatprep.mubr.msk.f32.mxu0 %vm330_vm0, %v675_v41  ;;  %v650_v47 = vmul.f32 %v645_v45, %v622_v43 }
 0x208   : > { %2615 = vmatmul.mubr.msk.f32.vlgmr.msra.gmra.mxu0 %vm330_vm0, %v676_v42  ;;  %v612_v9 = vpop.permute.xlu1 %611 }
 0x209   : > { %2649 = vmatpush3.msra.mxu0 %v2374_v19  ;;  %v621_v46 = vmul.f32 %v612_v9, %v597_v44  ;;  %v678_v53 = vadd.f32 %v673_v50, %v650_v47 }
 0x20a   : > { %2650 = vmatprep.subr.mxu0 %v2373_v1 }
 0x20b   : > { %2651 = vmatpush3.msra.mxu0 %v2373_v1  ;;  %v649_v2 = vmul.f32 %v640_v25, %v621_v46 }
 0x20c   : > { %2652 = vmatprep.subr.mxu0 %v2372_v0  ;;  %v668_v49 = vpop.permute.xlu1 %667 }
 0x20d   : > { %2653 = vmatpush3.msra.mxu0 %v2372_v0  ;;  %v677_v51 = vadd.f32 %v668_v49, %v649_v2 }
 0x20e   : > { %2654 = vmatprep.subr.mxu0 %v2371_v48 }
 0x20f   : > { %2655 = vmatpush3.msra.mxu0 %v2371_v48  ;;  %2617 = vmatprep.mubr.msk.f32.mxu0 %vm330_vm0, %v677_v51  ;;  %v3147_v48 = vld [vmem:[%s3312_s6 + $0x58] sm:$0xff] }
 0x210   : > { %2656 = vmatprep.subr.mxu0 %v2370_v52  ;;  %2618 = vmatmul.mubr.msk.f32.gmra.mxu0 %vm330_vm0, %v678_v53 }
 0x211   : > { %2657 = vmatpush3.msra.mxu0 %v2370_v52  ;;  %2664 = vmatprep.mubr.msk.f32.mxu0 %vm330_vm0, %v675_v41  ;;  %v3162_v52 = vld [vmem:[%s3312_s6 + $0x48] sm:$0xff] }
 0x212   : > { %2658 = vmatprep.subr.mxu0 %v2369_v54 }
 0x213   : > { %2659 = vmatpush3.msra.mxu0 %v2369_v54  ;;  %v3169_v54 = vld [vmem:[%s3312_s6 + $0x40] sm:$0xff] }
 0x214   : > { %2660 = vmatprep.subr.mxu0 %v2368_v55 }
 0x215   : > { %2661 = vmatpush3.msra.mxu0 %v2368_v55 }
 0x216   : > { %2662 = vmatprep.subr.mxu0 %v2367_v56 }
 0x217   : > { %2663 = vmatpush3.msra.mxu0 %v2367_v56 }
 0x218   : > { %2665 = vmatmul.mubr.msk.f32.vlgmr.msra.gmra.mxu0 %vm330_vm0, %v676_v42 }
 0x219   : > { %2667 = vmatprep.mubr.msk.f32.mxu0 %vm330_vm0, %v677_v51  ;;  %v3154_v51 = vld [vmem:[%s3312_s6 + $0x50] sm:$0xff] }
 0x21c   : > { %2668 = vmatmul.mubr.msk.f32.gmra.mxu0 %vm330_vm0, %v678_v53 }
 0x2c8   : > { %v2616_v60 = vpop.f32.mrf.mxu0 }
 0x2ca   : > { %v791_v62 = vpop.f32.mrf.mxu0 }
 0x2cb   : > { %816 = vxpose.xlu1.b32.start [1/4] (short) (narrow) %v791_v62, 32 }
 0x2cf   : > { %817 = vxpose.xlu1.b32.cont [2/4] (short) (narrow) %v2616_v60, 32 }
 0x2d0   : > { %v2619_v3 = vpop.f32.mrf.mxu0 }
 0x2d2   : > { %v801_v4 = vpop.f32.mrf.mxu0 }
 0x2d3   : > { %818 = vxpose.xlu1.b32.cont [3/4] (short) (narrow) %v801_v4, 32 }
 0x2d7   : > { %819 = vxpose.xlu1.b32.end [4/4] (short) (narrow) %v2619_v3, 32 }
 0x2d8   : > { %v2666_v5 = vpop.f32.mrf.mxu0 }
 0x2da   : > { %v1111_v6 = vpop.f32.mrf.mxu0 }
 0x2db   : > { %1130 = vxpose.xlu0.b32.start [1/4] (short) (narrow) %v1111_v6, 32 }
 0x2dc   : > { %v2669_v7 = vpop.f32.mrf.mxu0 }
 0x2de   : > { %v1121_v8 = vpop.f32.mrf.mxu0 }
 0x2df   : > { %1131 = vxpose.xlu0.b32.cont [2/4] (short) (narrow) %v2666_v5, 32 }
 0x2e3   : > { %1132 = vxpose.xlu0.b32.cont [3/4] (short) (narrow) %v1121_v8, 32 }
 0x2e7   : > { %1133 = vxpose.xlu0.b32.end [4/4] (short) (narrow) %v2669_v7, 32 }
 0x347   : > { %v3061_v10 = vpop.trf.xlu1 }
 0x348   : > { %2628 = vmatprep.mubr.msk.f32.mxu1 %vm363_vm1, %v3061_v10 }
 0x34b   : > { %v3065_v11 = vpop.trf.xlu1 }
 0x34c   : > { %2629 = vmatmul.mubr.msk.f32.vlgmr.msra.gmra.mxu1 %vm363_vm1, %v3065_v11 }
 0x34d   : > { %2635 = vmatpush3.msra.mxu1 %v2341_v63 }
 0x34e   : > { %2636 = vmatprep.subr.mxu1 %v2340_v12 }
 0x34f   : > { %v3075_v14 = vpop.trf.xlu1  ;;  %2637 = vmatpush3.msra.mxu1 %v2340_v12 }
 0x350   : > { %2631 = vmatprep.mubr.msk.f32.mxu1 %vm363_vm1, %v3075_v14  ;;  %2638 = vmatprep.subr.mxu1 %v2339_v13 }
 0x351   : > { %2639 = vmatpush3.msra.mxu1 %v2339_v13 }
 0x352   : > { %2640 = vmatprep.subr.mxu1 %v2338_v15 }
 0x353   : > { %v3082_v16 = vpop.trf.xlu1  ;;  %2641 = vmatpush3.msra.mxu1 %v2338_v15 }
 0x354   : > { %2632 = vmatmul.mubr.msk.f32.gmra.mxu1 %vm363_vm1, %v3082_v16  ;;  %2670 = vmatprep.subr.mxu1 %v682_v57 }
 0x355   : > { %2642 = vmatprep.mubr.msk.f32.mxu1 %vm363_vm1, %v3061_v10 }
 0x357   : > { %v3088_v17 = vpop.trf.xlu0 }
 0x358   : > { %2643 = vmatmul.mubr.msk.f32.vlgmr.msra.gmra.mxu1 %vm363_vm1, %v3065_v11 }
 0x359   : > { %2671 = vmatpush3.msra.mxu1 %v682_v57  ;;  %2645 = vmatprep.mubr.msk.f32.mxu1 %vm363_vm1, %v3075_v14 }
 0x35a   : > { %2672 = vmatprep.subr.mxu1 %v681_v58 }
 0x35b   : > { %2673 = vmatpush3.msra.mxu1 %v681_v58  ;;  %v3094_v18 = vpop.trf.xlu0 }
 0x35c   : > { %2674 = vmatprep.subr.mxu1 %v680_v59  ;;  %2646 = vmatmul.mubr.msk.f32.gmra.mxu1 %vm363_vm1, %v3082_v16 }
 0x35d   : > { %2675 = vmatpush3.msra.mxu1 %v680_v59  ;;  %2678 = vmatprep.mubr.msk.f32.mxu1 %vm363_vm1, %v3088_v17 }
 0x35e   : > { %2676 = vmatprep.subr.mxu1 %v679_v61 }
 0x35f   : > { %2677 = vmatpush3.msra.mxu1 %v679_v61  ;;  %v3100_v19 = vpop.trf.xlu0 }
 0x360   : > { %2684 = vmatprep.subr.mxu1 %v2341_v63  ;;  %2679 = vmatmul.mubr.msk.f32.vlgmr.msra.gmra.mxu1 %vm363_vm1, %v3094_v18 }
 0x361   : > { %2685 = vmatpush3.msra.mxu1 %v2341_v63  ;;  %2681 = vmatprep.mubr.msk.f32.mxu1 %vm363_vm1, %v3100_v19 }
 0x362   : > { %2686 = vmatprep.subr.mxu1 %v2340_v12 }
 0x363   : > { %2687 = vmatpush3.msra.mxu1 %v2340_v12  ;;  %v3106_v20 = vpop.trf.xlu0 }
 0x364   : > { %2688 = vmatprep.subr.mxu1 %v2339_v13  ;;  %2682 = vmatmul.mubr.msk.f32.gmra.mxu1 %vm363_vm1, %v3106_v20 }
 0x365   : > { %2689 = vmatpush3.msra.mxu1 %v2339_v13  ;;  %2692 = vmatprep.mubr.msk.f32.mxu1 %vm363_vm1, %v3088_v17  ;;  %v3191_v13 = vld [vmem:[%s3313_s7 + $0x2] ss:$0 sm:$0xff] }
 0x366   : > { %2690 = vmatprep.subr.mxu1 %v2338_v15 }
 0x367   : > { %2691 = vmatpush3.msra.mxu1 %v2338_v15 }
 0x368   : > { %2693 = vmatmul.mubr.msk.f32.vlgmr.msra.gmra.mxu1 %vm363_vm1, %v3094_v18 }
 0x369   : > { %2695 = vmatprep.mubr.msk.f32.mxu1 %vm363_vm1, %v3100_v19 }
 0x36c   : > { %2696 = vmatmul.mubr.msk.f32.gmra.mxu1 %vm363_vm1, %v3106_v20 }
 0x40c   : > { %v2630_v21 = vpop.f32.mrf.mxu1 }
 0x40d   : > { %v932_v44 = vadd.f32 %v2630_v21, %v2357_v22 }
 0x40e   : > { %v926_v23 = vpop.f32.mrf.mxu1 }
 0x40f   : > { %v927_v24 = vadd.f32 %v2357_v22, %v926_v23 }
 0x411   : > { %2720 = vmatprep.mubr.msk.f32.mxu1 %vm363_vm1, %v927_v24 }
 0x414   : > { %v2633_v25 = vpop.f32.mrf.mxu1 }
 0x415   : > { %v942_v0 = vadd.f32 %v2633_v25, %v2357_v22 }
 0x416   : > { %v936_v26 = vpop.f32.mrf.mxu1 }
 0x417   : > { %v937_v1 = vadd.f32 %v2357_v22, %v936_v26 }
 0x418   : > { %v2644_v27 = vpop.f32.mrf.mxu1 }
 0x419   : > { %v1023_v36 = vadd.f32 %v2644_v27, %v2362_v29 }
 0x41a   : > { %v1017_v28 = vpop.f32.mrf.mxu1 }
 0x41b   : > { %v1018_v40 = vadd.f32 %v2362_v29, %v1017_v28 }
 0x41c   : > { %v2647_v30 = vpop.f32.mrf.mxu1 }
 0x41d   : > { %v1033_v31 = vadd.f32 %v2647_v30, %v2362_v29 }
 0x41e   : > { %v1027_v32 = vpop.f32.mrf.mxu1 }
 0x41f   : > { %v1028_v33 = vadd.f32 %v2362_v29, %v1027_v32  ;;  %2712 = vmatprep.subr.msk.mxu1 %vm363_vm1, %v1033_v31 }
 0x420   : > { %v2680_v34 = vpop.f32.mrf.mxu1  ;;  %2713 = vmatpush3.xpose.msk.msra.mxu1 %vm363_vm1, %v1033_v31 }
 0x421   : > { %2714 = vmatprep.subr.msk.mxu1 %vm363_vm1, %v1028_v33  ;;  %v1246_v49 = vadd.f32 %v2680_v34, %v2357_v22 }
 0x422   : > { %v1240_v35 = vpop.f32.mrf.mxu1 }
 0x423   : > { %v1241_v37 = vadd.f32 %v2357_v22, %v1240_v35 }
 0x424   : > { %v2683_v38 = vpop.f32.mrf.mxu1  ;;  %2715 = vmatpush3.xpose.msk.msra.mxu1 %vm363_vm1, %v1028_v33 }
 0x425   : > { %2706 = vmatprep.mubr.msk.f32.mxu0 %vm363_vm1, %v1241_v37  ;;  %2716 = vmatprep.subr.msk.mxu1 %vm363_vm1, %v1023_v36  ;;  %v1256_v53 = vadd.f32 %v2683_v38, %v2357_v22 }
 0x426   : > { %v1250_v39 = vpop.f32.mrf.mxu1 }
 0x427   : > { %v1251_v50 = vadd.f32 %v2357_v22, %v1250_v39 }
 0x428   : > { %v2694_v41 = vpop.f32.mrf.mxu1  ;;  %2717 = vmatpush3.xpose.msk.msra.mxu1 %vm363_vm1, %v1023_v36 }
 0x429   : > { %2718 = vmatprep.subr.msk.mxu1 %vm363_vm1, %v1018_v40  ;;  %v1331_v47 = vadd.f32 %v2694_v41, %v2362_v29 }
 0x42a   : > { %v1325_v42 = vpop.f32.mrf.mxu1 }
 0x42b   : > { %v1326_v2 = vadd.f32 %v2362_v29, %v1325_v42 }
 0x42c   : > { %v2697_v43 = vpop.f32.mrf.mxu1  ;;  %2719 = vmatpush3.xpose.msk.msra.mxu1 %vm363_vm1, %v1018_v40 }
 0x42d   : > { %v1341_v45 = vadd.f32 %v2697_v43, %v2362_v29 }
 0x42e   : > { %v1335_v9 = vpop.f32.mrf.mxu1 }
 0x42f   : > { %v1336_v46 = vadd.f32 %v2362_v29, %v1335_v9  ;;  %2698 = vmatprep.subr.msk.mxu0 %vm363_vm1, %v1341_v45  ;;  %2721 = vmatmul.mubr.msk.f32.vlgmr.msra.gmra.mxu1 %vm363_vm1, %v932_v44 }
 0x430   : > { %2699 = vmatpush3.xpose.msk.msra.mxu0 %vm363_vm1, %v1341_v45  ;;  %2723 = vmatprep.mubr.msk.f32.mxu1 %vm363_vm1, %v937_v1 }
 0x431   : > { %2700 = vmatprep.subr.msk.mxu0 %vm363_vm1, %v1336_v46 }
 0x433   : > { %2724 = vmatmul.mubr.msk.f32.gmra.mxu1 %vm363_vm1, %v942_v0 }
 0x434   : > { %2701 = vmatpush3.xpose.msk.msra.mxu0 %vm363_vm1, %v1336_v46 }
 0x435   : > { %2702 = vmatprep.subr.msk.mxu0 %vm363_vm1, %v1331_v47 }
 0x438   : > { %2703 = vmatpush3.xpose.msk.msra.mxu0 %vm363_vm1, %v1331_v47 }
 0x439   : > { %2704 = vmatprep.subr.msk.mxu0 %vm363_vm1, %v1326_v2 }
 0x43c   : > { %2705 = vmatpush3.xpose.msk.msra.mxu0 %vm363_vm1, %v1326_v2 }
 0x43d   : > { %2726 = vmatprep.subr.mxu0 %v3147_v48 }
 0x43f   : > { %2707 = vmatmul.mubr.msk.f32.vlgmr.msra.gmra.mxu0 %vm363_vm1, %v1246_v49 }
 0x440   : > { %2709 = vmatprep.mubr.msk.f32.mxu0 %vm363_vm1, %v1251_v50  ;;  %2727 = vmatpush3.msra.mxu0 %v3147_v48 }
 0x441   : > { %2728 = vmatprep.subr.mxu0 %v3154_v51 }
 0x442   : > { %2729 = vmatpush3.msra.mxu0 %v3154_v51 }
 0x443   : > { %2710 = vmatmul.mubr.msk.f32.gmra.mxu0 %vm363_vm1, %v1256_v53  ;;  %2730 = vmatprep.subr.mxu0 %v3162_v52 }
 0x444   : > { %2731 = vmatpush3.msra.mxu0 %v3162_v52  ;;  %2734 = vmatprep.mubr.msk.f32.mxu0 %vm363_vm1, %v3061_v10 }
 0x445   : > { %2732 = vmatprep.subr.mxu0 %v3169_v54 }
 0x446   : > { %2733 = vmatpush3.msra.mxu0 %v3169_v54 }
 0x447   : > { %2735 = vmatmul.mubr.msk.f32.vlgmr.msra.gmra.mxu0 %vm363_vm1, %v3065_v11 }
 0x448   : > { %2737 = vmatprep.mubr.msk.f32.mxu0 %vm363_vm1, %v3075_v14 }
 0x44b   : > { %2738 = vmatmul.mubr.msk.f32.gmra.mxu0 %vm363_vm1, %v3082_v16 }
 0x4ef   : > { %v2722_v55 = vpop.f32.mrf.mxu1 }
 0x4f1   : > { %v1543_v56 = vpop.f32.mrf.mxu1 }
 0x4f3   : > { %v2725_v59 = vpop.f32.mrf.mxu1 }
 0x4f5   : > { %v1553_v5 = vpop.f32.mrf.mxu1 }
 0x4ff   : > { %v2708_v57 = vpop.f32.mrf.mxu0 }
 0x500   : > { %v1549_v58 = vadd.f32 %v2722_v55, %v2708_v57 }
 0x501   : > { %v1434_v60 = vpop.f32.mrf.mxu0 }
 0x502   : > { %v1544_v61 = vadd.f32 %v1543_v56, %v1434_v60  ;;  %v1565_v62 = vsel %vm363_vm1, %v1549_v58, -inf }
 0x503   : > { %1566 = vmax.xlane.f32.xlu1 %v1565_v62  ;;  %v2711_v63 = vpop.f32.mrf.mxu0 }
 0x504   : > { %v1559_v3 = vadd.f32 %v2725_v59, %v2711_v63  ;;  %v1562_v4 = vsel %vm363_vm1, %v1544_v61, -inf }
 0x505   : > { %1563 = vmax.xlane.f32.xlu0 %v1562_v4  ;;  %v1444_v6 = vpop.f32.mrf.mxu0 }
 0x506   : > { %v1554_v7 = vadd.f32 %v1553_v5, %v1444_v6  ;;  %v1571_v8 = vsel %vm363_vm1, %v1559_v3, -inf }
 0x507   : > { %1572 = vmax.xlane.f32.xlu1 %v1571_v8  ;;  %v2736_v10 = vpop.f32.mrf.mxu0 }
 0x508   : > { %v1568_v11 = vsel %vm363_vm1, %v1554_v7, -inf  ;;  %v1684_v22 = vadd.f32 %v2736_v10, %v3191_v13  ;;  %v1930_v10 = vld [vmem:[%s3265_s30 + $0x8] sm:$0xff] }
 0x509   : > { %v1678_v12 = vpop.f32.mrf.mxu0  ;;  %1569 = vmax.xlane.f32.xlu0 %v1568_v11 }
 0x50a   : > { %v1679_v23 = vadd.f32 %v3191_v13, %v1678_v12 }
 0x50b   : > { %v2739_v14 = vpop.f32.mrf.mxu0 }
 0x50c   : > { %v1694_v15 = vadd.f32 %v2739_v14, %v3191_v13 }
 0x50d   : > { %v1688_v16 = vpop.f32.mrf.mxu0 }
 0x50e   : > { %v1689_v21 = vadd.f32 %v3191_v13, %v1688_v16  ;;  %2740 = vmatprep.subr.mxu1 %v1694_v15 }
 0x50f   : > { %2741 = vmatpush3.msra.mxu1 %v1694_v15 }
 0x510   : > { %2742 = vmatprep.subr.mxu1 %v1689_v21 }
 0x511   : > { %2743 = vmatpush3.msra.mxu1 %v1689_v21 }
 0x512   : > { %2744 = vmatprep.subr.mxu1 %v1684_v22 }
 0x513   : > { %2745 = vmatpush3.msra.mxu1 %v1684_v22  ;;  %v1932_v22 = vld [vmem:[%s3265_s30 + $0x18] sm:$0xff] }
 0x514   : > { %2746 = vmatprep.subr.mxu1 %v1679_v23 }
 0x515   : > { %2747 = vmatpush3.msra.mxu1 %v1679_v23 }
 0x516   : > { %2768 = vmatprep.subr.mxu1 %v3147_v48 }
 0x58c   : > { %v1567_v24 = vpop.xlane.xlu1 %1566 }
 0x58d   : > { %v1575_v25 = vsub.f32 %v1549_v58, %v1567_v24 }
 0x58e   : > { %v1564_v26 = vpop.xlane.xlu0 %1563 }
 0x58f   : > { %v1580_v27 = vmul.f32 1.442695, %v1575_v25  ;;  %v1574_v28 = vsub.f32 %v1544_v61, %v1564_v26  ;;  %v1931_v25 = vld [vmem:[%s3265_s30 + $0x10] sm:$0xff] }
 0x590   : > { %v1573_v29 = vpop.xlane.xlu1 %1572 }
 0x591   : > { %2830 = vpow2.f32 %v1580_v27  ;;  %v1578_v30 = vmul.f32 1.442695, %v1574_v28  ;;  %v1577_v31 = vsub.f32 %v1559_v3, %v1573_v29 }
 0x592   : > { %v1570_v32 = vpop.xlane.xlu0 %1569 }
 0x593   : > { %2832 = vpow2.f32 %v1578_v30  ;;  %v1584_v33 = vmul.f32 1.442695, %v1577_v31  ;;  %v1576_v34 = vsub.f32 %v1554_v7, %v1570_v32  ;;  %v2412_v7 = vld [vmem:[%s3313_s7 + $0x3] ss:$0 sm:$0xff] }
 0x595   : > { %2834 = vpow2.f32 %v1584_v33  ;;  %v1582_v35 = vmul.f32 1.442695, %v1576_v34 }
 0x597   : > { %2836 = vpow2.f32 %v1582_v35 }
 0x59e   : > { %v2831_v36 = vpop.eup %2830 }
 0x59f   : > { %v1589_v37 = vsel %vm363_vm1, %v2831_v36, 0.0 }
 0x5a0   : > { %v2833_v38 = vpop.eup %2832  ;;  %1590 = vadd.xlane.f32.xlu1 %v1589_v37 }
 0x5a1   : > { %v1586_v39 = vsel %vm363_vm1, %v2833_v38, 0.0 }
 0x5a2   : > { %v2835_v40 = vpop.eup %2834  ;;  %1587 = vadd.xlane.f32.xlu0 %v1586_v39 }
 0x5a3   : > { %v1595_v41 = vsel %vm363_vm1, %v2835_v40, 0.0 }
 0x5a4   : > { %v2837_v42 = vpop.eup %2836  ;;  %1596 = vadd.xlane.f32.xlu1 %v1595_v41  ;;  %v2240_v41 = vld [vmem:[%s3265_s30 + $0x20] sm:$0xff] }
 0x5a5   : > { %v1592_v43 = vsel %vm363_vm1, %v2837_v42, 0.0 }
 0x5a6   : > { %1593 = vadd.xlane.f32.xlu0 %v1592_v43 }
 0x629   : > { %v1591_v44 = vpop.xlane.xlu1 %1590 }
 0x62a   : > { %2838 = vrcp.f32 %v1591_v44 }
 0x62b   : > { %v1588_v45 = vpop.xlane.xlu0 %1587 }
 0x62c   : > { %2840 = vrcp.f32 %v1588_v45 }
 0x62d   : > { %v1597_v1 = vpop.xlane.xlu1 %1596 }
 0x62e   : > { %2842 = vrcp.f32 %v1597_v1  ;;  %v2243_v1 = vld [vmem:[%s3265_s30 + $0x38] sm:$0xff] }
 0x62f   : > { %v1594_v9 = vpop.xlane.xlu0 %1593 }
 0x630   : > { %2844 = vrcp.f32 %v1594_v9 }
 0x637   : > { %v2839_v46 = vpop.eup %2838 }
 0x638   : > { %v3204_v2 = vmul.f32 %v2839_v46, %v2831_v36 }
 0x639   : > { %v2841_v0 = vpop.eup %2840 }
 0x63a   : > { %v3202_v47 = vmul.f32 %v2841_v0, %v2833_v38  ;;  %v2241_v38 = vld [vmem:[%s3265_s30 + $0x28] sm:$0xff]  ;;  %v2242_v0 = vld [vmem:[%s3265_s30 + $0x30] sm:$0xff] }
 0x63b   : > { %v2843_v49 = vpop.eup %2842 }
 0x63c   : > { %2748 = vmatprep.mubr.msk.f32.mxu1 %vm363_vm1, %v3202_v47  ;;  %v3214_v55 = vmul.f32 %v2843_v49, %v2835_v40 }
 0x63d   : > { %v2845_v50 = vpop.eup %2844  ;;  %2749 = vmatmul.mubr.msk.f32.vlgmr.msra.gmra.mxu1 %vm363_vm1, %v3204_v2 }
 0x63e   : > { %2769 = vmatpush3.msra.mxu1 %v3147_v48  ;;  %v3211_v53 = vmul.f32 %v2845_v50, %v2837_v42  ;;  %v2349_v48 = vld [vmem:[%s3312_s6 + $0x78] sm:$0xff] }
 0x63f   : > { %2770 = vmatprep.subr.mxu1 %v3154_v51  ;;  %2754 = vmatprep.subr.mxu0 %v2349_v48 }
 0x640   : > { %2751 = vmatprep.mubr.msk.f32.mxu1 %vm363_vm1, %v3211_v53  ;;  %2771 = vmatpush3.msra.mxu1 %v3154_v51 }
 0x641   : > { %2752 = vmatmul.mubr.msk.f32.gmra.mxu1 %vm363_vm1, %v3214_v55  ;;  %2772 = vmatprep.subr.mxu1 %v3162_v52 }
 0x642   : > { %2773 = vmatpush3.msra.mxu1 %v3162_v52  ;;  %2776 = vmatprep.mubr.msk.f32.mxu1 %vm363_vm1, %v3088_v17  ;;  %v2348_v17 = vld [vmem:[%s3312_s6 + $0x70] sm:$0xff] }
 0x643   : > { %2774 = vmatprep.subr.mxu1 %v3169_v54  ;;  %2755 = vmatpush3.msra.mxu0 %v2349_v48 }
 0x644   : > { %2775 = vmatpush3.msra.mxu1 %v3169_v54  ;;  %2756 = vmatprep.subr.mxu0 %v2348_v17 }
 0x645   : > { %2777 = vmatmul.mubr.msk.f32.vlgmr.msra.gmra.mxu1 %vm363_vm1, %v3094_v18  ;;  %2796 = vmatprep.subr.mxu1 %v2349_v48  ;;  %v2347_v18 = vld [vmem:[%s3312_s6 + $0x68] sm:$0xff] }
 0x646   : > { %2779 = vmatprep.mubr.msk.f32.mxu1 %vm363_vm1, %v3100_v19  ;;  %2797 = vmatpush3.msra.mxu1 %v2349_v48  ;;  %v2346_v19 = vld [vmem:[%s3312_s6 + $0x60] sm:$0xff] }
 0x647   : > { %2798 = vmatprep.subr.mxu1 %v2348_v17  ;;  %2757 = vmatpush3.msra.mxu0 %v2348_v17 }
 0x648   : > { %2799 = vmatpush3.msra.mxu1 %v2348_v17  ;;  %2758 = vmatprep.subr.mxu0 %v2347_v18 }
 0x649   : > { %2780 = vmatmul.mubr.msk.f32.gmra.mxu1 %vm363_vm1, %v3106_v20  ;;  %2800 = vmatprep.subr.mxu1 %v2347_v18 }
 0x64a   : > { %2759 = vmatpush3.msra.mxu0 %v2347_v18  ;;  %2801 = vmatpush3.msra.mxu1 %v2347_v18 }
 0x64b   : > { %2760 = vmatprep.subr.mxu0 %v2346_v19  ;;  %2802 = vmatprep.subr.mxu1 %v2346_v19 }
 0x64c   : > { %2761 = vmatpush3.msra.mxu0 %v2346_v19  ;;  %2803 = vmatpush3.msra.mxu1 %v2346_v19 }
 0x6fd   : > { %v2750_v20 = vpop.f32.mrf.mxu1 }
 0x6ff   : > { %v1775_v51 = vpop.f32.mrf.mxu1 }
 0x700   : > { %1800 = vxpose.xlu0.b32.start [1/4] (short) (narrow) %v1775_v51, 32 }
 0x701   : > { %v2753_v52 = vpop.f32.mrf.mxu1 }
 0x703   : > { %v1785_v54 = vpop.f32.mrf.mxu1 }
 0x704   : > { %1801 = vxpose.xlu0.b32.cont [2/4] (short) (narrow) %v2750_v20, 32 }
 0x705   : > { %v2778_v56 = vpop.f32.mrf.mxu1 }
 0x706   : > { %v2013_v3 = vadd.f32 %v2778_v56, %v3191_v13 }
 0x707   : > { %v2007_v57 = vpop.f32.mrf.mxu1 }
 0x708   : > { %1802 = vxpose.xlu0.b32.cont [3/4] (short) (narrow) %v1785_v54, 32  ;;  %v2008_v5 = vadd.f32 %v3191_v13, %v2007_v57 }
 0x709   : > { %v2781_v58 = vpop.f32.mrf.mxu1 }
 0x70a   : > { %v2023_v59 = vadd.f32 %v2781_v58, %v3191_v13 }
 0x70b   : > { %v2017_v61 = vpop.f32.mrf.mxu1 }
 0x70c   : > { %1803 = vxpose.xlu0.b32.end [4/4] (short) (narrow) %v2753_v52, 32  ;;  %2782 = vmatprep.subr.mxu0 %v2023_v59  ;;  %v2018_v63 = vadd.f32 %v3191_v13, %v2017_v61  ;;  %v1929_v13 = vld [vmem:[%s3265_s30] sm:$0xff] }
 0x77c   : > { %v1816_v60 = vpop.trf.xlu0 }
 0x77d   : > { %2762 = vmatprep.mubr.msk.f32.mxu0 %vm363_vm1, %v1816_v60 }
 0x780   : > { %v1817_v62 = vpop.trf.xlu0 }
 0x781   : > { %2763 = vmatmul.mubr.msk.f32.vlgmr.msra.gmra.mxu0 %vm363_vm1, %v1817_v62 }
 0x782   : > { %2783 = vmatpush3.msra.mxu0 %v2023_v59 }
 0x783   : > { %2784 = vmatprep.subr.mxu0 %v2018_v63 }
 0x784   : > { %2785 = vmatpush3.msra.mxu0 %v2018_v63  ;;  %v1818_v4 = vpop.trf.xlu0 }
 0x785   : > { %2786 = vmatprep.subr.mxu0 %v2013_v3  ;;  %2765 = vmatprep.mubr.msk.f32.mxu0 %vm363_vm1, %v1818_v4 }
 0x786   : > { %2787 = vmatpush3.msra.mxu0 %v2013_v3 }
 0x787   : > { %2788 = vmatprep.subr.mxu0 %v2008_v5 }
 0x788   : > { %2789 = vmatpush3.msra.mxu0 %v2008_v5  ;;  %v1819_v6 = vpop.trf.xlu0 }
 0x789   : > { %2766 = vmatmul.mubr.msk.f32.gmra.mxu0 %vm363_vm1, %v1819_v6 }
 0x78a   : > { %2790 = vmatprep.mubr.msk.f32.mxu0 %vm363_vm1, %v3202_v47 }
 0x78d   : > { %2791 = vmatmul.mubr.msk.f32.vlgmr.msra.gmra.mxu0 %vm363_vm1, %v3204_v2 }
 0x78e   : > { %2793 = vmatprep.mubr.msk.f32.mxu0 %vm363_vm1, %v3211_v53 }
 0x791   : > { %2794 = vmatmul.mubr.msk.f32.gmra.mxu0 %vm363_vm1, %v3214_v55 }
 0x841   : > { %v2764_v8 = vpop.f32.mrf.mxu0 }
 0x842   : > { %v1916_v11 = vadd.f32 %v2764_v8, %v2412_v7 }
 0x843   : > { %v1910_v12 = vpop.f32.mrf.mxu0 }
 0x844   : > { %v1934_v14 = vadd.f32 %v1930_v10, %v1916_v11  ;;  %v1911_v15 = vadd.f32 %v2412_v7, %v1910_v12 }
 0x846   : > { %1938 = vst.msk [vmem:[%s3274_s28 + $0x8] sm:$0xff] %vm363_vm1, %v1934_v14  ;;  %v1933_v16 = vadd.f32 %v1929_v13, %v1911_v15 }
 0x848   : > { %1937 = vst.msk [vmem:[%s3274_s28] sm:$0xff] %vm363_vm1, %v1933_v16 }
 0x849   : > { %v2767_v21 = vpop.f32.mrf.mxu0 }
 0x84a   : > { %v1926_v23 = vadd.f32 %v2767_v21, %v2412_v7 }
 0x84b   : > { %v1920_v24 = vpop.f32.mrf.mxu0 }
 0x84c   : > { %v1936_v26 = vadd.f32 %v1932_v22, %v1926_v23  ;;  %v1921_v27 = vadd.f32 %v2412_v7, %v1920_v24 }
 0x84d   : > { %v2792_v28 = vpop.f32.mrf.mxu0 }
 0x84e   : > { %1940 = vst.msk [vmem:[%s3274_s28 + $0x18] sm:$0xff] %vm363_vm1, %v1936_v26  ;;  %v1935_v29 = vadd.f32 %v1931_v25, %v1921_v27 }
 0x84f   : > { %v2092_v30 = vpop.f32.mrf.mxu0 }
 0x850   : > { %1939 = vst.msk [vmem:[%s3274_s28 + $0x10] sm:$0xff] %vm363_vm1, %v1935_v29  ;;  %2111 = vxpose.xlu1.b32.start [1/4] (short) (narrow) %v2092_v30, 32 }
 0x851   : > { %v2795_v31 = vpop.f32.mrf.mxu0 }
 0x853   : > { %v2102_v32 = vpop.f32.mrf.mxu0 }
 0x854   : > { %2112 = vxpose.xlu1.b32.cont [2/4] (short) (narrow) %v2792_v28, 32 }
 0x858   : > { %2113 = vxpose.xlu1.b32.cont [3/4] (short) (narrow) %v2102_v32, 32 }
 0x85c   : > { %2114 = vxpose.xlu1.b32.end [4/4] (short) (narrow) %v2795_v31, 32 }
 0x8cc   : > { %v2127_v33 = vpop.trf.xlu1 }
 0x8cd   : > { %2804 = vmatprep.mubr.msk.f32.mxu1 %vm363_vm1, %v2127_v33 }
 0x8d0   : > { %v2128_v34 = vpop.trf.xlu1 }
 0x8d1   : > { %2805 = vmatmul.mubr.msk.f32.vlgmr.msra.gmra.mxu1 %vm363_vm1, %v2128_v34 }
 0x8d4   : > { %v2129_v35 = vpop.trf.xlu1 }
 0x8d5   : > { %2807 = vmatprep.mubr.msk.f32.mxu1 %vm363_vm1, %v2129_v35 }
 0x8d8   : > { %v2130_v36 = vpop.trf.xlu1 }
 0x8d9   : > { %2808 = vmatmul.mubr.msk.f32.gmra.mxu1 %vm363_vm1, %v2130_v36 }
 0x991   : > { %v2806_v37 = vpop.f32.mrf.mxu1 }
 0x992   : > { %v2227_v39 = vadd.f32 %v2806_v37, %v2412_v7 }
 0x993   : > { %v2221_v40 = vpop.f32.mrf.mxu1 }
 0x994   : > { %v2245_v42 = vadd.f32 %v2241_v38, %v2227_v39  ;;  %v2222_v43 = vadd.f32 %v2412_v7, %v2221_v40 }
 0x996   : > { %2249 = vst.msk [vmem:[%s3274_s28 + $0x28] sm:$0xff] %vm363_vm1, %v2245_v42  ;;  %v2244_v44 = vadd.f32 %v2240_v41, %v2222_v43 }
 0x998   : > { %2248 = vst.msk [vmem:[%s3274_s28 + $0x20] sm:$0xff] %vm363_vm1, %v2244_v44 }
 0x999   : > { %v2809_v45 = vpop.f32.mrf.mxu1 }
 0x99a   : > { %v2237_v9 = vadd.f32 %v2809_v45, %v2412_v7 }
 0x99b   : > { %v2231_v46 = vpop.f32.mrf.mxu1 }
 0x99c   : > { %v2247_v47 = vadd.f32 %v2243_v1, %v2237_v9  ;;  %v2232_v2 = vadd.f32 %v2412_v7, %v2231_v46 }
 0x99e   : > { %2251 = vst.msk [vmem:[%s3274_s28 + $0x38] sm:$0xff] %vm363_vm1, %v2247_v47  ;;  %v2246_v49 = vadd.f32 %v2242_v0, %v2232_v2 }
 0x9a0   : > { %2250 = vst.msk [vmem:[%s3274_s28 + $0x30] sm:$0xff] %vm363_vm1, %v2246_v49 }
 0x9a1 PF: > { %s18_s27 = sadd.s32 1, %s2852_s27  }
 0x9a2   : > { %p15_p4 = scmp.ge.s32.totalorder %s18_s27, 4  }
 0x9a4   :  { %17 = sbr.rel (!%p15_p4) target bundleno = 1 (0x1), region = 92 }

</bundles_post_ra>
